<compile_context>
chip_gen: v5e
topology: v5e:2x2
jax: 0.10.0
libtpu: 0.0.40
codegen_flags: <defaults>
</compile_context>

<pallas_src>
import functools

import jax
import jax.numpy as jnp
from jax import lax
from jax.experimental import pallas as pl
from jax.experimental.pallas import tpu as pltpu


_A_RESIDENT_MAX_BYTES = 2 * 1024 * 1024   # hold activations fully in VMEM below this


def _matmul_epilogue_kernel(a_ref, w_ref, r_ref, o_ref, acc_ref, *,
                            combine, a_resident):
    """One (n, k) grid step of  o = epilogue(a @ w.T, r).

    w is streamed in its NATURAL (un-transposed) layout; the contraction is
    expressed by contracting the last dim of both operands, so the wrapper never
    materializes a transposed NxN copy.
    grid = (N // tile, K // tile); reduction axis last, f32 VMEM accumulator
    resident across k (init / finalize via pl.when).
      combine == "scale": o = (a @ w.T) * r     (r is a (1, tile) row vector)
      combine == "add"  : o = (a @ w.T) + r
    """
    k = pl.program_id(1)

    @pl.when(k == 0)
    def _():
        acc_ref[...] = jnp.zeros_like(acc_ref)

    if a_resident:
        # Whole activation lives in VMEM as (nk, B, tile); pick the k-th chunk.
        a = a_ref[k]
    else:
        a = a_ref[...]

    # (B, tile) x (tile_n, tile_k) -> (B, tile_n), contracting the shared last dim
    # (i.e. a @ w.T) — MXU matmul with bf16 operands, f32 accumulation.
    acc_ref[...] += lax.dot_general(
        a, w_ref[...],
        dimension_numbers=(((1,), (1,)), ((), ())),
        preferred_element_type=jnp.float32,
    )

    @pl.when(k == pl.num_programs(1) - 1)
    def _():
        acc = acc_ref[...]
        r = r_ref[...]                      # (1, tile) -> broadcasts over rows
        out = acc * r if combine == "scale" else acc + r
        o_ref[...] = out.astype(o_ref.dtype)


def _vmem_budget_bytes():
    """Generation-aware scoped-VMEM budget: ~3/4 of physical, capped at 96 MiB.
    => ~48 MiB on v7x (64 MiB/TC), 96 MiB on v5e/v6e (128 MiB)."""
    cap = 64 * 1024 * 1024                 # conservative fallback (v7x per-TC VMEM)
    try:
        info = pltpu.get_tpu_info()
        cap = int(getattr(info, "vmem_capacity_bytes", cap) or cap)
    except Exception:
        pass
    return min(cap * 3 // 4, 96 * 1024 * 1024)


def _choose_tile(B, N, *, w_itemsize, a_itemsize, out_itemsize, budget,
                 max_tile=2048):
    """Largest 128-multiple tile dividing N that fits the VMEM budget, preferring
    >= 2 (ideally an even number of) output-column tiles for v7x megacore."""
    candidates = [c for c in range(128, min(N, max_tile) + 1, 128) if N % c == 0]
    if not candidates:
        return N                           # tiny N (< 128): single full-extent tile
    fit_budget = max(budget - (2 << 20), 4 << 20)   # headroom for Mosaic internals
    resident = B * N * a_itemsize <= _A_RESIDENT_MAX_BYTES

    def need(t):
        a_bytes = (2 * B * N if resident else 2 * B * t) * a_itemsize
        return (2 * t * t * w_itemsize     # weight tile, double buffered
                + a_bytes                  # activations (streamed or resident)
                + 2 * B * t * out_itemsize # output tile, double buffered
                + B * t * 4                # f32 accumulator scratch
                + 4 * t * 4)               # S / bias row tiles

    fitting = [c for c in candidates if need(c) <= fit_budget]
    if not fitting:
        return 128
    multi = [c for c in fitting if N // c >= 2]
    even = [c for c in multi if (N // c) % 2 == 0]
    pool = even or multi or fitting
    return max(pool)


def _tiled_matmul_epilogue(a, w, r, *, combine, tile, out_dtype, vmem_limit):
    """o[b, n] = epilogue(sum_k a[b, k] * w[n, k], r[0, n])   (tiled, pipelined).

    `w` is in natural (N, K) layout — no wrapper transpose."""
    B, K = a.shape
    N, Kw = w.shape
    assert K == Kw and r.shape == (1, N)
    assert N % tile == 0 and K % tile == 0
    nk = K // tile

    a_resident = B * K * a.dtype.itemsize <= _A_RESIDENT_MAX_BYTES
    if a_resident:
        # One DMA of the whole (small) activation instead of re-streaming it for
        # every output-column strip.  Laid out (nk, B, tile) so the kernel grabs
        # chunk k with a plain leading-dim index; the reshape/transpose below
        # touches <= _A_RESIDENT_MAX_BYTES, negligible next to the NxN weight.
        a_arg = jnp.transpose(a.reshape(B, nk, tile), (1, 0, 2))
        a_spec = pl.BlockSpec((nk, B, tile), lambda n, k: (0, 0, 0))
        a_hbm_bytes = B * K * a.dtype.itemsize
    else:
        a_arg = a
        a_spec = pl.BlockSpec((B, tile), lambda n, k: (0, k))
        a_hbm_bytes = (N // tile) * B * K * a.dtype.itemsize

    bytes_accessed = (
        a_hbm_bytes
        + w.size * w.dtype.itemsize
        + r.size * r.dtype.itemsize
        + B * N * jnp.dtype(out_dtype).itemsize
    )

    return pl.pallas_call(
        functools.partial(_matmul_epilogue_kernel,
                          combine=combine, a_resident=a_resident),
        out_shape=jax.ShapeDtypeStruct((B, N), out_dtype),
        grid_spec=pltpu.PrefetchScalarGridSpec(
            num_scalar_prefetch=0,
            grid=(N // tile, K // tile),
            in_specs=[
                a_spec,
                # Weight tile in NATURAL layout, indexed (output_tile, k_tile).
                # TODO(synk): add pipeline_mode=pl.Buffered(3) here if DMA is
                # still exposed after tile sizing (VMEM headroom permitting).
                pl.BlockSpec((tile, tile), lambda n, k: (n, k)),
                # r (S or bias): one lane-dense block per output-column tile,
                # identical across the reduction axis (no re-DMA per k step).
                pl.BlockSpec((1, tile), lambda n, k: (0, n)),
            ],
            out_specs=pl.BlockSpec((B, tile), lambda n, k: (0, n)),
            scratch_shapes=[pltpu.VMEM((B, tile), jnp.float32)],
        ),
        compiler_params=pltpu.CompilerParams(
            # n-axis parallel -> shards across v7x's 2 TensorCores; k is the
            # reduction (output-resident accumulator) so it must be arbitrary.
            dimension_semantics=("parallel", "arbitrary"),
            vmem_limit_bytes=vmem_limit,
        ),
        cost_estimate=pl.CostEstimate(
            flops=2 * B * K * N,
            transcendentals=0,
            bytes_accessed=int(bytes_accessed),
        ),
    )(a_arg, w, r)


def linear_usv_forward(x, U, S, V, bias, *, tile=None, stream_dtype=jnp.bfloat16):
    """y = x @ (U @ diag(S) @ V).T + bias, computed as ((x @ V.T) * S) @ U.T + bias."""
    B, N = x.shape
    assert U.shape == (N, N) and V.shape == (N, N)
    assert S.shape == (N,) and bias.shape == (N,)
    out_dtype = x.dtype

    # Robustness: pad non-128-aligned N up to a multiple of 256 (MXU-native on
    # v6e/v7x) so every block stays lane-dense and VMEM-sized.  Zero padding is
    # exact: padded rows/cols of U, V, S, bias contribute nothing.
    # TODO(synk): for repeated calls with fixed weights, pre-pad (and pre-cast)
    # the parameters once at init instead of per call.
    Np = N if N % 128 == 0 else -(-N // 256) * 256
    if Np != N:
        p = Np - N
        x = jnp.pad(x, ((0, 0), (0, p)))
        U = jnp.pad(U, ((0, p), (0, p)))
        V = jnp.pad(V, ((0, p), (0, p)))
        S = jnp.pad(S, ((0, p),))
        bias = jnp.pad(bias, ((0, p),))

    # HBM-bandwidth bound at skinny B: stream the big operands (and the MXU
    # activations) in bf16; accumulate and apply S/bias in f32.
    # TODO(synk): on v7x an fp8 weight path (per-tile scales fused into the
    # epilogue) would halve weight traffic again; v7x MXU has no int8 datapath.
    x_s = x.astype(stream_dtype)
    U_s = U.astype(stream_dtype)
    V_s = V.astype(stream_dtype)
    s2d = S.reshape(1, Np).astype(jnp.float32)
    b2d = bias.reshape(1, Np).astype(jnp.float32)

    vmem_limit = _vmem_budget_bytes()
    if tile is None:
        tile = _choose_tile(
            B, Np,
            w_itemsize=jnp.dtype(stream_dtype).itemsize,
            a_itemsize=jnp.dtype(stream_dtype).itemsize,
            out_itemsize=max(jnp.dtype(stream_dtype).itemsize,
                             jnp.dtype(out_dtype).itemsize),
            budget=vmem_limit,
        )
    assert Np % tile == 0

    # pass 1: t = (x @ V.T) * S    (V natural layout, S fused into the epilogue;
    #                               t stored bf16 — same rounding the MXU applies)
    t = _tiled_matmul_epilogue(x_s, V_s, s2d, combine="scale", tile=tile,
                               out_dtype=stream_dtype, vmem_limit=vmem_limit)
    # pass 2: y = t @ U.T + bias   (U natural layout, bias fused into the epilogue)
    y = _tiled_matmul_epilogue(t, U_s, b2d, combine="add", tile=tile,
                               out_dtype=out_dtype, vmem_limit=vmem_limit)
    return y[:, :N] if Np != N else y


if __name__ == "__main__":
    # Small but MXU/lane-aligned demo: batch=8, size_in == size_out == 256.
    # The tile chooser picks 128 here (keeps N//tile == 2), so the accumulator
    # init/finalize, multi-tile pipelining, and resident-activation paths are
    # all exercised on a (2, 2) grid.
    B, N = 8, 256

    key = jax.random.PRNGKey(0)
    kx, ku, ks, kv, kb = jax.random.split(key, 5)
    x = jax.random.normal(kx, (B, N), dtype=jnp.float32)
    U = jax.random.normal(ku, (N, N), dtype=jnp.float32) * 0.1
    S = jax.random.normal(ks, (N,), dtype=jnp.float32)
    V = jax.random.normal(kv, (N, N), dtype=jnp.float32) * 0.1
    bias = jax.random.normal(kb, (N,), dtype=jnp.float32) * 0.1

    out = linear_usv_forward(x, U, S, V, bias)
    jax.block_until_ready(out)

    hp = jax.lax.Precision.HIGHEST
    f32 = jnp.float32

    # Exact PyTorch-semantics reference (f32, HIGHEST precision).
    weight = jnp.dot(U * S[None, :], V, precision=hp)          # U @ diag(S) @ V
    ref_f32 = jnp.dot(x, weight.T, precision=hp) + bias[None, :]

    # Reference mirroring the kernel's deliberate bf16 streaming (bf16 operands,
    # f32 accumulation, bf16 intermediate) — tight check of the kernel logic.
    xb = x.astype(jnp.bfloat16).astype(f32)
    Ub = U.astype(jnp.bfloat16).astype(f32)
    Vb = V.astype(jnp.bfloat16).astype(f32)
    t_emu = (jnp.dot(xb, Vb.T, precision=hp) * S[None, :]
             ).astype(jnp.bfloat16).astype(f32)
    ref_emu = jnp.dot(t_emu, Ub.T, precision=hp) + bias[None, :]

    assert jnp.allclose(out, ref_emu, atol=5e-3, rtol=5e-3), \
        "kernel mismatch vs bf16-emulated reference"
    # Loose sanity check vs full-precision semantics (bf16 streaming trades a few
    # e-2 absolute error for ~2x HBM bandwidth); catches any orientation bug.
    assert jnp.allclose(out, ref_f32, atol=0.5, rtol=0.1), \
        "kernel mismatch vs f32 reference"

    print("KERNEL_OK")
</pallas_src>

<mosaic_0001>
module attributes {stable_mosaic.version = 11 : i64} {
  func.func @_matmul_epilogue_kernel(%arg0: i32, %arg1: i32, %arg2: memref<2x8x128xbf16, #tpu.memory_space<vmem>>, %arg3: memref<128x128xbf16, #tpu.memory_space<vmem>>, %arg4: memref<1x128xf32, #tpu.memory_space<vmem>>, %arg5: memref<8x128xbf16, #tpu.memory_space<vmem>>, %arg6: memref<8x128xf32, #tpu.memory_space<vmem>>) attributes {dimension_semantics = [#tpu.dimension_semantics<parallel>, #tpu.dimension_semantics<arbitrary>], iteration_bounds = array<i64: 2, 2>, scalar_prefetch = 0 : i64, scratch_operands = 1 : i64, tpu.core_type = #tpu.core_type<tc>, window_params = [{pipeline_mode = #tpu.pipeline_mode<synchronous>, transform_indices = @transform_0, window_bounds = array<i64: 2, 8, 128>}, {transform_indices = @transform_1, window_bounds = array<i64: 128, 128>}, {transform_indices = @transform_2, window_bounds = array<i64: 1, 128>}, {transform_indices = @transform_3, window_bounds = array<i64: 8, 128>}]} {
    %c0_i32 = arith.constant 0 : i32
    %0 = arith.cmpi eq, %arg1, %c0_i32 : i32
    %1 = arith.extui %0 : i1 to i32
    %c0_i32_0 = arith.constant 0 : i32
    %2 = arith.cmpi ne, %1, %c0_i32_0 : i32
    scf.if %2 {
      %cst_9 = arith.constant 0.000000e+00 : f32
      %14 = vector.broadcast %cst_9 : f32 to vector<8x128xf32>
      %c0_10 = arith.constant 0 : index
      %c0_11 = arith.constant 0 : index
      %15 = vector.load %arg6[%c0_10, %c0_11] : memref<8x128xf32, #tpu.memory_space<vmem>>, vector<8x128xf32>
      tpu.vector_store %arg6[%c0_10, %c0_11], %14 {strides = array<i32>} : memref<8x128xf32, #tpu.memory_space<vmem>>, vector<8x128xf32>,
    } else {
    }
    %3 = arith.index_cast %arg1 : i32 to index
    %c0 = arith.constant 0 : index
    %c0_1 = arith.constant 0 : index
    %4 = vector.load %arg2[%3, %c0, %c0_1] : memref<2x8x128xbf16, #tpu.memory_space<vmem>>, vector<1x8x128xbf16>
    %5 = vector.shape_cast %4 : vector<1x8x128xbf16> to vector<8x128xbf16>
    %c0_2 = arith.constant 0 : index
    %c0_3 = arith.constant 0 : index
    %6 = vector.load %arg6[%c0_2, %c0_3] : memref<8x128xf32, #tpu.memory_space<vmem>>, vector<8x128xf32>
    %c0_4 = arith.constant 0 : index
    %c0_5 = arith.constant 0 : index
    %7 = vector.load %arg3[%c0_4, %c0_5] : memref<128x128xbf16, #tpu.memory_space<vmem>>, vector<128x128xbf16>
    %cst = arith.constant dense<0.000000e+00> : vector<8x128xf32>
    %8 = tpu.matmul %5, %7, %cst {dimension_numbers = #tpu.dot_dimension_numbers<[1], [1], [0], [0], [0, 0, 1, 0], [], []>} : vector<8x128xbf16>, vector<128x128xbf16>, vector<8x128xf32> -> vector<8x128xf32>
    %9 = arith.addf %6, %8 : vector<8x128xf32>
    %c0_6 = arith.constant 0 : index
    %c0_7 = arith.constant 0 : index
    %10 = vector.load %arg6[%c0_6, %c0_7] : memref<8x128xf32, #tpu.memory_space<vmem>>, vector<8x128xf32>
    tpu.vector_store %arg6[%c0_6, %c0_7], %9 {strides = array<i32>} : memref<8x128xf32, #tpu.memory_space<vmem>>, vector<8x128xf32>,
    %c1_i32 = arith.constant 1 : i32
    %11 = arith.cmpi eq, %arg1, %c1_i32 : i32
    %12 = arith.extui %11 : i1 to i32
    %c0_i32_8 = arith.constant 0 : i32
    %13 = arith.cmpi ne, %12, %c0_i32_8 : i32
    scf.if %13 {
      %c0_9 = arith.constant 0 : index
      %c0_10 = arith.constant 0 : index
      %14 = vector.load %arg6[%c0_9, %c0_10] : memref<8x128xf32, #tpu.memory_space<vmem>>, vector<8x128xf32>
      %c0_11 = arith.constant 0 : index
      %c0_12 = arith.constant 0 : index
      %15 = vector.load %arg4[%c0_11, %c0_12] : memref<1x128xf32, #tpu.memory_space<vmem>>, vector<1x128xf32>
      %16 = vector.broadcast %15 : vector<1x128xf32> to vector<8x128xf32>
      %17 = arith.mulf %14, %16 : vector<8x128xf32>
      %18 = arith.truncf %17 : vector<8x128xf32> to vector<8x128xbf16>
      %c0_13 = arith.constant 0 : index
      %c0_14 = arith.constant 0 : index
      %19 = vector.load %arg5[%c0_13, %c0_14] : memref<8x128xbf16, #tpu.memory_space<vmem>>, vector<8x128xbf16>
      tpu.vector_store %arg5[%c0_13, %c0_14], %18 {strides = array<i32>} : memref<8x128xbf16, #tpu.memory_space<vmem>>, vector<8x128xbf16>,
    } else {
    }
    return
  }
  func.func @transform_0(%arg0: i32, %arg1: i32) -> (i32, i32, i32) {
    %c0_i32 = arith.constant 0 : i32
    %c0_i32_0 = arith.constant 0 : i32
    %c0_i32_1 = arith.constant 0 : i32
    %c0_i32_2 = arith.constant 0 : i32
    return %c0_i32, %c0_i32_0, %c0_i32_1 : i32, i32, i32
  }
  func.func @transform_1(%arg0: i32, %arg1: i32) -> (i32, i32) {
    %c0_i32 = arith.constant 0 : i32
    return %arg0, %arg1 : i32, i32
  }
  func.func @transform_2(%arg0: i32, %arg1: i32) -> (i32, i32) {
    %c0_i32 = arith.constant 0 : i32
    %c0_i32_0 = arith.constant 0 : i32
    return %c0_i32, %arg0 : i32, i32
  }
  func.func @transform_3(%arg0: i32, %arg1: i32) -> (i32, i32) {
    %c0_i32 = arith.constant 0 : i32
    %c0_i32_0 = arith.constant 0 : i32
    return %c0_i32, %arg0 : i32, i32
  }
}

</mosaic_0001>

<bundles_post_ra>
// kernel: tpu_custom_call.1
= control target key start
LH: loop header
LB: loop body
LE: loop exit
PB: predicated region body
PF: predicated region fallthrough
CT: control target
= control target key end

     0   :  { %s1165_s0 = inlined_call_operand.hbm [shape: bf16[2,8,128], index: 0, kind: input, shape index: {}]   ;;  %s1166_s1 = inlined_call_operand.hbm [shape: bf16[256,256], index: 1, kind: input, shape index: {}]   ;;  %s1167_s2 = inlined_call_operand.hbm [shape: f32[1,256], index: 2, kind: input, shape index: {}]   ;;  %s1168_s3 = inlined_call_operand.hbm [shape: bf16[8,256], index: 3, kind: output, shape index: {}]  }
   0x1   :  { %1172 = sst [smem:[#allocation16_spill]] %s1165_s0 }
   0x2   :  { %1173 = sst [smem:[#allocation17_spill]] %s1168_s3 }
   0x3   :  { %8 = vsyncpa [#allocation4], 0 }
   0x4   :  { %9 = vsyncpa [#allocation7], 0 }
   0x5   :  { %11 = vsyncpa [#allocation7 + $0x1], 0 }
   0x6   :  { %12 = vsyncpa [#allocation5], 0 }
   0x7   :  { %14 = vsyncpa [#allocation5 + $0x1], 0  ;;  %s917_s12 = smov 0   ;;  %s919_s13 = smov 0  }
   0x8   :  { %s921_s14 = smov 0   ;;  %s923_s15 = smov 0  }
   0x9   :  { %s925_s16 = smov 0   ;;  %s927_s17 = smov 0  }
   0xa   :  { %s929_s18 = smov 0   ;;  %s931_s19 = smov 0  }
   0xb   :  { %s933_s20 = smov 0   ;;  %s935_s21 = smov 0  }
   0xc   :  { %s937_s22 = smov 0  }
   0xd LB: > { %s29_s23 = sadd.s32 1, %s882_s20  ;;  %s32_s24 = sadd.s32 1, %s886_s21  ;;  %s890_s22 = sphi %s937_s22, %s20_s22   ;;  %s886_s21 = sphi %s935_s21, %s1196_s21   ;;  %s882_s20 = sphi %s933_s20, %s1195_s20   ;;  %s878_s19 = sphi %s931_s19, %s1194_s19   ;;  %s874_s18 = sphi %s929_s18, %s1193_s18   ;;  %s870_s17 = sphi %s927_s17, %s1192_s17   ;;  %s866_s16 = sphi %s925_s16, %s1191_s16   ;;  %s862_s15 = sphi %s923_s15, %s1190_s15   ;;  %s858_s14 = sphi %s921_s14, %s1189_s14   ;;  %s854_s13 = sphi %s919_s13, %s1188_s13   ;;  %s850_s12 = sphi %s917_s12, %s1187_s12  }
   0xe   : > { %p30_p0 = scmp.ge.s32.totalorder %s29_s23, 2  ;;  %s62_s25 = sadd.s32 1, %s870_s17 }
   0xf   : > { %p69_p1 = scmp.ne.s32.totalorder %s870_s17, %s866_s16  ;;  %p70_p2 = scmp.eq.s32.totalorder %s890_s22, 0 }
  0x10   : > { %s1198_s23 = smov (%p30_p0, %s29_s23), 0  ;;  %s1200_s24 = smov (!%p30_p0, %s32_s24), %s886_s21 }
  0x11   : > { %1174 = sst [smem:[#allocation14_spill]] %s1198_s23  ;;  %s58_s26 = ssub.s32 %s882_s20, %s1198_s23 }
  0x12   : > { %p985_p3 = por %p70_p2, %p69_p1  ;;  %p34_p4 = scmp.ge.s32.totalorder %s1200_s24, 2 }
  0x13   : > { %p75_p5 = scmp.ne.s32.totalorder %s866_s16, %s862_s15  ;;  %p573_p6 = scmp.lt.s32.totalorder %s890_s22, 4 }
  0x14   : > { %s1202_s24 = smov (%p34_p4, %s1200_s24), 0  ;;  %s165_s29 = sand.u32 1, %s890_s22  }
  0x15   : > { %1176 = sst [smem:[#allocation15_spill]] %s1202_s24  ;;  %s996_s28 = ssub.s32 %s886_s21, %s1202_s24 }
  0x16   : > { %s59_s30 = sor.u32 %s58_s26, %s996_s28  ;;  %s167_s4 = sand.u32 1, %s870_s17  }
  0x17   : > { %p60_p7 = scmp.eq.s32.totalorder %s59_s30, 0  ;;  %s491_s5 = sshll.u32 %s167_s4, 6 }
  0x18   : > { %s538_s6 = sshll.u32 %s886_s21, 5  ;;  %s169_s10 = scalar_lea.vmem [#allocation6], %s491_s5 }
  0x19   : > { %s1003_s7 = scalar_select %p60_p7, %s870_s17, %s62_s25  }
  0x1a   : > { %s174_s8 = sadd.s32 %s882_s20, %s538_s6  ;;  %s179_s11 = sshll.u32 %s169_s10, 4  ;;  %s180_s11 = int_to_ptr.vmem [resolvable:$true] %s179_s11 }
  0x1b   : > { %s494_s9 = sshll.u32 %s174_s8, 2  ;;  %p562_p8 = pnand %p573_p6, %p985_p3 }
  0x1c   : > { %s176_s3 = scalar_lea.hbm %s1166_s1, %s494_s9  ;;  %s1013_s25 = scalar_lea.sflag [#allocation7], %s165_s29 }
  0x1d   : > { %s177_s26 = sshll.u32 %s176_s3, 4  ;;  %s892_s30 = smov 128   ;;  %s178_s26 = int_to_ptr.hbm [resolvable:$true] %s177_s26 }
  0x1e   : > { %s893_s4 = smov 64   ;;  %s894_s6 = smov 4  }
  0x1f   : > { %564 = dma.hbm_to_vmem [thread:$0]  (!%p562_p8), %s178_s26, 1024, %s180_s11, %s1013_s25, %s892_s30, %s893_s4, %s894_s6  }
  0x20   : > { %s1017_s5 = sadd.s32 4294967295, %s890_s22   ;;  %p488_p10 = scmp.ge.s32.totalorder %s890_s22, 1 }
  0x21   : > { %p76_p9 = scmp.eq.s32.totalorder %s1017_s5, 0  ;;  %p138_p11 = scmp.lt.s32.totalorder %s890_s22, 5 }
  0x22   : > { %s1178_s0 = sld [smem:[#allocation16_spill]]  ;;  %s895_s15 = smov [#allocation3]  }
  0x23   : > { %p1027_p12 = por %p76_p9, %p75_p5  ;;  %p1034_p13 = pnand %p488_p10, %p138_p11 }
  0x24   : > { %s151_s8 = sshll.u32 %s895_s15, 4  ;;  %s487_s9 = sadd.s32 4294967294, %s890_s22   ;;  %s152_s8 = int_to_ptr.vmem [resolvable:$true] %s151_s8 }
  0x25   : > { %p557_p0 = pneg %p1034_p13  ;;  %p86_p3 = scmp.eq.s32.totalorder %s996_s28, 0 }
  0x26   : > { %s88_s10 = sadd.s32 1, %s858_s14  ;;  %p95_p4 = scmp.ne.s32.totalorder %s858_s14, %s854_s13 }
  0x27   : > { %p558_p1 = pnand %p557_p0, %p76_p9  ;;  %p101_p7 = scmp.ne.s32.totalorder %s854_s13, %s850_s12 }
  0x28   : > { %s149_s27 = sshll.u32 %s1178_s0, 4  ;;  %p1052_p5 = por %p95_p4, %p70_p2  ;;  %s150_s27 = int_to_ptr.hbm [resolvable:$true] %s149_s27 }
  0x29   : > { %560 = dma.hbm_to_vmem [thread:$0]  (!%p558_p1), %s150_s27, 128, %s152_s8, [#allocation4], %s893_s4, %s893_s4, %s894_s6  }
  0x2a   : > { %s1048_s11 = scalar_select %p86_p3, %s858_s14, %s88_s10  }
  0x2b   : > { %p125_p8 = scmp.eq.s32.totalorder %s1017_s5, 3  ;;  %p131_p10 = scmp.eq.s32.totalorder %s487_s9, 3 }
  0x2c   : > { %p1061_p11 = por %p101_p7, %p76_p9  ;;  %s191_s28 = sand.u32 1, %s858_s14  }
  0x2d   : > { %p1066_p0 = por %p125_p8, %p95_p4  ;;  %p1070_p1 = por %p131_p10, %p101_p7 }
  0x2e   : > { %s195_s27 = scalar_lea.hbm %s1167_s2, %s886_s21  ;;  %s192_s8 = scalar_lea.vmem [#allocation8], %s191_s28 }
  0x2f   : > { %s197_s15 = sshll.u32 %s195_s27, 4  ;;  %s199_s9 = sshll.u32 %s192_s8, 4  ;;  %s198_s15 = int_to_ptr.hbm [resolvable:$true] %s197_s15  ;;  %s200_s9 = int_to_ptr.vmem [resolvable:$true] %s199_s9 }
  0x30   : > { %p565_p2 = pnand %p573_p6, %p1052_p5  ;;  %208 = sbr.rel (%p1034_p13) target bundleno = 295 (0x127), region = 32 }
  0x32   : > { %567 = dma.hbm_to_vmem [thread:$0]  (!%p565_p2), %s198_s15, 16, %s200_s9, %s1013_s25  }
  0x35   : > { %833 = dma.done.wait (%p76_p9), [#allocation4], 128  }
  0x36   : > { %835 = vsyncadd (%p76_p9), [#allocation4], 4294967168  ;;  %s215_s10 = sand.u32 1, %s1017_s5   ;;  %s217_s28 = sand.u32 1, %s866_s16  }
  0x37   : > { %s497_s23 = sshll.u32 %s217_s28, 6  ;;  %s216_s24 = scalar_lea.sflag [#allocation7], %s215_s10 }
  0x38   : > { %s219_s26 = scalar_lea.vmem [#allocation6], %s497_s23 }
  0x39   : > { %837 = dma.done.wait (%p1027_p12), %s216_s24, 1024  }
  0x3a   : > { %839 = vsyncadd (%p1027_p12), %s216_s24, 4294966272  ;;  %s1096_s25 = sand.u32 1, %s854_s13  }
  0x3b   : > { %s228_s29 = scalar_lea.vmem [#allocation8], %s1096_s25 }
  0x3c   : > { %841 = dma.done.wait (%p1061_p11), %s216_s24, 16  }
  0x3d   : > { %843 = vsyncadd (%p1061_p11), %s216_s24, 4294967280  ;;  %s498_s5 = sshll.u32 %s1096_s25, 2  ;;  %p499_p6 = scmp.ne.s32.totalorder %s874_s18, 0 }
  0x3e   : > { %s1104_s27 = scalar_lea.vmem [#allocation9], %s498_s5 }
  0x3f   : > { %260 = sbr.rel (%p499_p6) target bundleno = 70 (0x46), region = 48 }
  0x44   : > { %v896_v0 = vmov 0.0  }
  0x45   : > { %261 = vst [vmem:[#allocation2] sm:$0xff] %v896_v0 }
  0x46 PF: > { %v546_v1 = vld [vmem:[%s219_s26 + $0x38] sm:$0xff]  ;;  %v545_v2 = vld [vmem:[%s219_s26 + $0x30] sm:$0xff]  ;;  %v544_v3 = vld [vmem:[%s219_s26 + $0x28] sm:$0xff]  ;;  %s500_s3 = sshll.u32 %s874_s18, 2  ;;  %p533_p9 = scmp.ne.s32.totalorder %s874_s18, 1 }
  0x47   : > { %330 = vmatpush.bf16.xpose.msra.mxu0 %v546_v1  ;;  %v543_v4 = vld [vmem:[%s219_s26 + $0x20] sm:$0xff]  ;;  %v542_v5 = vld [vmem:[%s219_s26 + $0x18] sm:$0xff]  ;;  %v541_v6 = vld [vmem:[%s219_s26 + $0x10] sm:$0xff]  ;;  %s263_s30 = scalar_lea.vmem [#allocation3], %s500_s3 }
  0x48   : > { %v540_v7 = vld [vmem:[%s219_s26 + $0x8] sm:$0xff]  ;;  %v539_v8 = vld [vmem:[%s219_s26] sm:$0xff]  ;;  %v264_v9 = vld [vmem:[%s263_s30] sm:$0xf] }
  0x4c   : > { %v265_v10 = vld [vmem:[#allocation2] sm:$0xff] }
  0x4f   : > { %331 = vmatpush.bf16.xpose.msra.mxu0 %v545_v2 }
  0x57   : > { %332 = vmatpush.bf16.xpose.msra.mxu0 %v544_v3 }
  0x5f   : > { %333 = vmatpush.bf16.xpose.msra.mxu0 %v543_v4 }
  0x67   : > { %334 = vmatpush.bf16.xpose.msra.mxu0 %v542_v5 }
  0x6f   : > { %335 = vmatpush.bf16.xpose.msra.mxu0 %v541_v6 }
  0x77   : > { %336 = vmatpush.bf16.xpose.msra.mxu0 %v540_v7 }
  0x7f   : > { %337 = vmatpush.bf16.xpose.msra.mxu0 %v539_v8 }
  0x86   : > { %338 = vmatmul.bf16.vlgmr.msra.gmra.mxu0 %v264_v9 }
 0x103   : > { %v339_v11 = vpop.f32.mrf.mxu0 }
 0x104   : > { %v343_v12 = vadd.f32 %v339_v11, %v265_v10 }
 0x106   : > { %344 = vst [vmem:[#allocation2] sm:$0xff] %v343_v12 }
 0x107   : > { %348 = sbr.rel (%p533_p9) target bundleno = 275 (0x113), region = 52 }
 0x10b   : > { %v341_v13 = vpop.f32.mrf.mxu0 }
 0x10c   : > { %v669_v15 = vld [vmem:[%s228_s29] ss:$0 sm:$0xff] }
 0x10d   : > { %v349_v14 = vld [vmem:[#allocation2] sm:$0xff] }
 0x10e   : > { %v354_v16 = vmul.f32 %v669_v15, %v349_v14 }
 0x110   : > { %v355_v17 = vpack.c.bf16 %v354_v16, %v354_v16 }
 0x112   : > { %356 = vst [vmem:[%s1104_s27] sm:$0xf] %v355_v17 }
 0x113 PF: > { %s535_s15 = sshll.u32 %s878_s19, 2  ;;  %s1184_s10 = sld [smem:[#allocation17_spill]] }
 0x114   : > { %s370_s18 = sshll.u32 %s1104_s27, 4  ;;  %s358_s24 = scalar_lea.sflag [#allocation5], %s1096_s25  ;;  %s371_s18 = int_to_ptr.vmem [resolvable:$true] %s370_s18 }
 0x119   : > { %s368_s28 = scalar_lea.hbm %s1184_s10, %s535_s15  ;;  %s780_s19 = scalar_lea.hbm %s1184_s10, 8 }
 0x11a   : > { %s372_s23 = sshll.u32 %s368_s28, 4  ;;  %s373_s23 = int_to_ptr.hbm [resolvable:$true] %s372_s23 }
 0x11b   : > { %s774_s26 = sshra.s32 %s373_s23, 4  ;;  %s775_s26 = int_to_ptr.hbm [resolvable:$true] %s774_s26 }
 0x11c   : > { %s776_s29 = scalar_lea.hbm %s775_s26, 4  ;;  %p781_p4 = scmp.lt.s32.totalorder %s775_s26, %s1184_s10 }
 0x11d   : > { %p777_p12 = scmp.ne.s32.totalorder %s775_s26, %s776_s29  ;;  %p782_p5 = scmp.lt.s32.totalorder %s780_s19, %s776_s29 }
 0x11f   : > { %p778_p13 = pnand %p777_p12, %p1066_p0  ;;  %p783_p7 = por %p782_p5, %p781_p4 }
 0x121   : > { %p779_p3 = pneg %p778_p13 }
 0x123   : > { %p784_p8 = pnand %p783_p7, %p779_p3 }
 0x125   : > { %787 = shalt.err (!%p784_p8)
}
 0x126   : > { %555 = dma.vmem_to_hbm [thread:$0]  (%p1066_p0), %s371_s18, 64, %s373_s23, %s358_s24  }
 0x127 PF: > { %p575_p10 = scmp.ge.s32.totalorder %s890_s22, 2  ;;  %s384_s25 = sand.u32 1, %s850_s12  }
 0x128   : > { %s385_s27 = scalar_lea.sflag [#allocation5], %s384_s25 }
 0x129   : > { %p569_p11 = pnand %p575_p10, %p1070_p1 }
 0x12b   : > { %p570_p2 = pneg %p569_p11 }
 0x12d   : > { %845 = dma.done.wait (%p570_p2), %s385_s27, 64  }
 0x12e   : > { %847 = vsyncadd (%p570_p2), %s385_s27, 4294967232  ;;  %s20_s22 = sadd.s32 1, %s890_s22   ;;  %s1185_s0 = sld [smem:[#allocation14_spill]] }
 0x12f   : > { %p17_p6 = scmp.ge.s32.totalorder %s20_s22, 6   ;;  %s1186_s4 = sld [smem:[#allocation15_spill]] }
 0x130   : > { %s1187_s12 = smov %s854_s13  ;;  %s1188_s13 = smov %s858_s14 }
 0x131   : > { %s1189_s14 = smov %s1048_s11  ;;  %s1190_s15 = smov %s866_s16 }
 0x132   : > { %s1191_s16 = smov %s870_s17  ;;  %s1192_s17 = smov %s1003_s7 }
 0x133   : > { %s1193_s18 = smov %s882_s20  ;;  %s1194_s19 = smov %s886_s21 }
 0x134   : > { %s1195_s20 = smov %s1185_s0  ;;  %19 = sbr.rel (!%p17_p6) target bundleno = 13 (0xd), region = 102 }
 0x135   : > { %s1196_s21 = smov %s1186_s4 }
 0x139   :  { %391 = vsyncpa [#allocation4], 1 }
 0x13a   :  { %393 = vsyncpa [#allocation4 + $0x1], 1 }
 0x13b   :  { %394 = vsyncpa [#allocation7], 1 }
 0x13c   :  { %396 = vsyncpa [#allocation7 + $0x1], 1 }
 0x13d   :  { %397 = vsyncpa [#allocation5], 1 }
 0x13e   :  { %399 = vsyncpa [#allocation5 + $0x1], 1 }

</bundles_post_ra>
